<compile_context>
chip_gen: v6e
topology: v6e:2x2x1
jax: 0.10.0
libtpu: 0.0.40
codegen_flags: <defaults>
</compile_context>

<pallas_src>
import jax
import jax.numpy as jnp
from jax.experimental import pallas as pl
from jax.experimental.pallas import tpu as pltpu


# ----------------------------------------------------------------------------
# Shared in-kernel conv tile: k*k accumulating MXU dots on lane-shifted views of
# the (Cin, tm + halo) input window.  Result is masked (invalid / padded cols -> 0).
# ----------------------------------------------------------------------------
def _conv_tile(xwin_ref, w_ref, mask_ref, *, k, cin, cout, wp, tm):
    y = None
    for idx in range(k * k):
        dh, dw = idx // k, idx % k
        d = dh * wp + dw                                    # static lane offset
        lhs = w_ref[:, idx * cin:(idx + 1) * cin]           # (Cout, Cin)
        rhs = xwin_ref[0, :, d:d + tm]                      # (Cin, tm) shifted view
        t = jnp.dot(lhs, rhs, preferred_element_type=jnp.float32)
        y = t if y is None else y + t
    return y * mask_ref[...]                                # zero invalid/padded columns


# ----------------------------------------------------------------------------
# Fast path: fully fused conv + batch stats + BN + ReLU, VMEM-resident (Cout, Mpad)
# output (gated on VMEM budget).
# ----------------------------------------------------------------------------
def _fused_conv_bn_relu(xwin, wflat, mask, gamma, beta, *, k, cin, cout, wp, tm,
                        m_valid, eps, vmem_limit):
    nt = xwin.shape[0]
    win = xwin.shape[2]
    mpad = mask.shape[1]
    kd = k * k * cin
    inv_m = 1.0 / float(m_valid)

    def kernel(xwin_ref, w_ref, m_ref, g_ref, b_ref, o_ref, sum_ref, ssq_ref):
        j = pl.program_id(0)

        @pl.when(j == 0)
        def _init():
            sum_ref[...] = jnp.zeros_like(sum_ref)
            ssq_ref[...] = jnp.zeros_like(ssq_ref)

        y = _conv_tile(xwin_ref, w_ref, m_ref, k=k, cin=cin, cout=cout, wp=wp, tm=tm)

        start = pl.multiple_of(j * tm, tm)
        o_ref[:, pl.ds(start, tm)] = y                       # lane-dense store
        sum_ref[...] += jnp.sum(y, axis=1, keepdims=True)
        ssq_ref[...] += jnp.sum(y * y, axis=1, keepdims=True)

        @pl.when(j == pl.num_programs(0) - 1)
        def _finalize():
            mean = sum_ref[...] * inv_m
            var = ssq_ref[...] * inv_m - mean * mean         # biased batch variance
            inv_std = jax.lax.rsqrt(var + eps)
            scale = g_ref[...] * inv_std
            shift = b_ref[...] - mean * scale
            o_ref[...] = jnp.maximum(o_ref[...] * scale + shift, 0.0)

    isz = jnp.dtype(xwin.dtype).itemsize
    cost = pl.CostEstimate(
        flops=2 * kd * cout * mpad + 8 * cout * mpad,
        transcendentals=cout,
        bytes_accessed=xwin.size * isz + wflat.size * isz + mask.size * 4 + cout * mpad * 4,
    )

    return pl.pallas_call(
        kernel,
        out_shape=jax.ShapeDtypeStruct((cout, mpad), jnp.float32),
        grid=(nt,),
        in_specs=[
            pl.BlockSpec((1, cin, win), lambda j: (j, 0, 0)),   # input window, pipelined
            pl.BlockSpec((cout, kd), lambda j: (0, 0)),         # weights, resident
            pl.BlockSpec((1, tm), lambda j: (0, j)),            # validity mask tile
            pl.BlockSpec((cout, 1), lambda j: (0, 0)),          # gamma
            pl.BlockSpec((cout, 1), lambda j: (0, 0)),          # beta
        ],
        out_specs=pl.BlockSpec((cout, mpad), lambda j: (0, 0)), # resident accumulator
        scratch_shapes=[pltpu.VMEM((cout, 1), jnp.float32),
                        pltpu.VMEM((cout, 1), jnp.float32)],
        compiler_params=pltpu.CompilerParams(
            dimension_semantics=("arbitrary",),
            vmem_limit_bytes=vmem_limit),
        cost_estimate=cost,
    )(xwin, wflat, mask, gamma, beta)


# ----------------------------------------------------------------------------
# Fallback pass 1: conv + per-slice partial stats, tiled (pipelined) output.
# Leading "parallel" axis lets v7x use both TensorCores (each slice owns its stats).
# ----------------------------------------------------------------------------
def _conv_stats_pass(xwin, wflat, mask, *, k, cin, cout, wp, tm, n_par, vmem_limit):
    nt = xwin.shape[0]
    win = xwin.shape[2]
    mpad = mask.shape[1]
    kd = k * k * cin
    nm = nt // n_par

    def kernel(xwin_ref, w_ref, m_ref, y_ref, psum_ref, pssq_ref):
        j = pl.program_id(1)

        @pl.when(j == 0)
        def _init():
            psum_ref[...] = jnp.zeros_like(psum_ref)
            pssq_ref[...] = jnp.zeros_like(pssq_ref)

        y = _conv_tile(xwin_ref, w_ref, m_ref, k=k, cin=cin, cout=cout, wp=wp, tm=tm)
        y_ref[...] = y
        psum_ref[0] = psum_ref[0] + jnp.sum(y, axis=1, keepdims=True)
        pssq_ref[0] = pssq_ref[0] + jnp.sum(y * y, axis=1, keepdims=True)

    return pl.pallas_call(
        kernel,
        out_shape=(jax.ShapeDtypeStruct((cout, mpad), jnp.float32),
                   jax.ShapeDtypeStruct((n_par, cout, 1), jnp.float32),
                   jax.ShapeDtypeStruct((n_par, cout, 1), jnp.float32)),
        grid=(n_par, nm),
        in_specs=[
            pl.BlockSpec((1, cin, win), lambda c, j: (c * nm + j, 0, 0)),
            pl.BlockSpec((cout, kd), lambda c, j: (0, 0)),
            pl.BlockSpec((1, tm), lambda c, j: (0, c * nm + j)),
        ],
        out_specs=(pl.BlockSpec((cout, tm), lambda c, j: (0, c * nm + j)),
                   pl.BlockSpec((1, cout, 1), lambda c, j: (c, 0, 0)),
                   pl.BlockSpec((1, cout, 1), lambda c, j: (c, 0, 0))),
        compiler_params=pltpu.CompilerParams(
            dimension_semantics=("parallel", "arbitrary"),
            vmem_limit_bytes=vmem_limit),
    )(xwin, wflat, mask)


# ----------------------------------------------------------------------------
# Fallback pass 2: tiled, pipelined BN + ReLU apply.
# ----------------------------------------------------------------------------
def _bn_relu_apply(y_raw, scale, shift, *, tm, vmem_limit):
    cout, mpad = y_raw.shape
    nt = mpad // tm

    def kernel(y_ref, sc_ref, sh_ref, o_ref):
        o_ref[...] = jnp.maximum(y_ref[...] * sc_ref[...] + sh_ref[...], 0.0)

    return pl.pallas_call(
        kernel,
        out_shape=jax.ShapeDtypeStruct((cout, mpad), jnp.float32),
        grid=(nt,),
        in_specs=[pl.BlockSpec((cout, tm), lambda j: (0, j)),
                  pl.BlockSpec((cout, 1), lambda j: (0, 0)),
                  pl.BlockSpec((cout, 1), lambda j: (0, 0))],
        out_specs=pl.BlockSpec((cout, tm), lambda j: (0, j)),
        compiler_params=pltpu.CompilerParams(
            dimension_semantics=("parallel",),
            vmem_limit_bytes=vmem_limit),
    )(y_raw, scale, shift)


# ----------------------------------------------------------------------------
# Host-side wrapper: padded flattened slab + overlapping windows + path selection.
# ----------------------------------------------------------------------------
def conv_block_forward(x_nchw, w_pt, bias, gamma, beta, *, kernel_size, stride,
                       tm=2048, matmul_dtype=jnp.bfloat16, n_par=2,
                       force_two_pass=False, out_layout="NCHW", eps=1e-5):
    """ConvBlock.forward: relu(bn(conv(x))), BN using training-mode batch statistics.
    bias is accepted for nn.Conv2d interface parity but unused: the BN mean subtraction
    cancels it exactly."""
    del bias  # mathematically a no-op under training-mode BN
    N, Cin, H, W = x_nchw.shape
    Cout = w_pt.shape[0]
    k, s = kernel_size, stride
    p = k // 2
    Ho = (H - k + 2 * p) // s + 1
    Wo = (W - k + 2 * p) // s + 1
    Hp, Wp = H + 2 * p, W + 2 * p
    Mp = N * Hp * Wp                       # conv evaluated on the full padded grid
    m_valid = N * Ho * Wo                  # real output positions (BN count)
    halo = (k - 1) * Wp + (k - 1)
    halo_pad = pl.cdiv(halo, 128) * 128

    # ---- M tile (multiple of 128, clamped to problem size) ----
    tm = max(128, min(int(tm), pl.cdiv(Mp, 128) * 128))
    tm = (tm // 128) * 128
    nt = pl.cdiv(Mp, tm)

    # ---- VMEM budget / path selection ----
    try:
        vmem_cap = int(pltpu.get_tpu_info().vmem_capacity_bytes)
    except Exception:
        vmem_cap = 64 * 1024 * 1024        # conservative (v7x per-TC physical)
    vmem_limit = vmem_cap * 3 // 4
    isz = jnp.dtype(matmul_dtype).itemsize
    fused_bytes = (2 * Cout * (nt * tm) * 4          # resident f32 output (2 buffers)
                   + 2 * Cin * (tm + halo_pad) * isz # double-buffered input windows
                   + 2 * tm * 4 + (1 << 20))         # mask tiles + slack
    two_pass = force_two_pass or fused_bytes > vmem_limit
    if two_pass:
        nt = pl.cdiv(nt, n_par) * n_par
    mpad = nt * tm

    # ---- flattened padded input slab (Cin, N*Hp*Wp), extended for shifts/tiles ----
    xp = jnp.pad(x_nchw, ((0, 0), (0, 0), (p, p), (p, p)))
    xflat = jnp.transpose(xp, (1, 0, 2, 3)).reshape(Cin, Mp).astype(matmul_dtype)
    L = mpad + halo_pad
    xflat = jnp.pad(xflat, ((0, 0), (0, L - Mp)))

    # ---- overlapping (Cin, tm + halo) windows; only the small halo is duplicated ----
    win = tm + halo_pad
    starts = jnp.arange(nt, dtype=jnp.int32) * tm
    gidx = starts[:, None] + jnp.arange(win, dtype=jnp.int32)[None, :]
    xwin = jnp.transpose(xflat[:, gidx], (1, 0, 2))          # (nt, Cin, win)

    # ---- validity mask over padded-grid positions (stride + edge exclusion) ----
    hvalid = (jnp.arange(Hp) % s == 0) & (jnp.arange(Hp) < Ho * s)
    wvalid = (jnp.arange(Wp) % s == 0) & (jnp.arange(Wp) < Wo * s)
    mask_img = (hvalid[:, None] & wvalid[None, :]).astype(jnp.float32)
    mask = jnp.tile(mask_img.reshape(-1), (N,))
    mask = jnp.pad(mask, (0, mpad - Mp)).reshape(1, mpad)

    # (Cout, Cin, kH, kW) -> (Cout, kH, kW, Cin) -> (Cout, Kd); matches offset ordering.
    wflat = jnp.transpose(w_pt, (0, 2, 3, 1)).reshape(Cout, k * k * Cin).astype(matmul_dtype)
    g2 = gamma.reshape(Cout, 1).astype(jnp.float32)
    b2 = beta.reshape(Cout, 1).astype(jnp.float32)

    if not two_pass:
        yt = _fused_conv_bn_relu(xwin, wflat, mask, g2, b2, k=k, cin=Cin, cout=Cout,
                                 wp=Wp, tm=tm, m_valid=m_valid, eps=eps,
                                 vmem_limit=vmem_limit)
    else:
        y_raw, psum, pssq = _conv_stats_pass(xwin, wflat, mask, k=k, cin=Cin, cout=Cout,
                                             wp=Wp, tm=tm, n_par=n_par,
                                             vmem_limit=vmem_limit)
        ssum = jnp.sum(psum, axis=0)                          # combine per-slice partials
        sssq = jnp.sum(pssq, axis=0)
        mean = ssum / float(m_valid)
        var = sssq / float(m_valid) - mean * mean
        scale = g2 * jax.lax.rsqrt(var + eps)
        shift = b2 - mean * scale
        yt = _bn_relu_apply(y_raw, scale, shift, tm=tm, vmem_limit=vmem_limit)

    # ---- extract valid positions; kernel-native layout is (Cout, N, Ho, Wo) ----
    y4 = yt[:, :Mp].reshape(Cout, N, Hp, Wp)
    y4 = y4[:, :, 0:(Ho - 1) * s + 1:s, 0:(Wo - 1) * s + 1:s]
    if out_layout == "CNHW":
        return y4                                             # skips the transpose pass
    return jnp.transpose(y4, (1, 0, 2, 3))                    # NCHW (module parity)


# ----------------------------------------------------------------------------
# Pure-JAX reference for verification (includes the conv bias).
# ----------------------------------------------------------------------------
def reference_forward(x_nchw, w_pt, bias, gamma, beta, *, kernel_size, stride,
                      conv_dtype=jnp.float32):
    pad = kernel_size // 2
    y = jax.lax.conv_general_dilated(
        x_nchw.astype(conv_dtype), w_pt.astype(conv_dtype),
        window_strides=(stride, stride), padding=[(pad, pad), (pad, pad)],
        dimension_numbers=("NCHW", "OIHW", "NCHW"),
        preferred_element_type=jnp.float32)
    y = y + bias.reshape(1, -1, 1, 1)
    mean = jnp.mean(y, axis=(0, 2, 3), keepdims=True)
    var = jnp.mean((y - mean) ** 2, axis=(0, 2, 3), keepdims=True)
    out = (y - mean) * jax.lax.rsqrt(var + 1e-5) * gamma.reshape(1, -1, 1, 1) \
          + beta.reshape(1, -1, 1, 1)
    return jnp.maximum(out, 0.0)


if __name__ == "__main__":
    # Module config: ConvBlock(input_size=4, output_size=8, kernel_size=3, stride=1)
    Cin, Cout, K, S = 4, 8, 3, 1
    N, H, W = 2, 16, 16

    key = jax.random.PRNGKey(0)
    kx, kw, kb = jax.random.split(key, 3)
    x = jax.random.normal(kx, (N, Cin, H, W), dtype=jnp.float32)
    w_pt = jax.random.normal(kw, (Cout, Cin, K, K), dtype=jnp.float32) * 0.1
    bias = jax.random.normal(kb, (Cout,), dtype=jnp.float32) * 0.1
    gamma = jnp.ones((Cout,), dtype=jnp.float32)   # BatchNorm2d default affine init
    beta = jnp.zeros((Cout,), dtype=jnp.float32)

    ref32 = reference_forward(x, w_pt, bias, gamma, beta, kernel_size=K, stride=S)
    ref16 = reference_forward(x, w_pt, bias, gamma, beta, kernel_size=K, stride=S,
                              conv_dtype=jnp.bfloat16)

    # f32, fused fast path: single big tile and multi-tile stats carry.
    for tm in (4096, 128):
        out = conv_block_forward(x, w_pt, bias, gamma, beta, kernel_size=K, stride=S,
                                 tm=tm, matmul_dtype=jnp.float32)
        out = jax.block_until_ready(out)
        assert out.shape == (N, Cout, H, W)
        err = float(jnp.max(jnp.abs(out - ref32)))
        assert jnp.allclose(out, ref32, rtol=5e-4, atol=5e-4), \
            f"f32 fused tm={tm}: max abs err {err}"

    # f32, forced two-pass fallback (tiled output + parallel partial stats + apply pass).
    out = conv_block_forward(x, w_pt, bias, gamma, beta, kernel_size=K, stride=S,
                             tm=128, matmul_dtype=jnp.float32, force_two_pass=True)
    out = jax.block_until_ready(out)
    err = float(jnp.max(jnp.abs(out - ref32)))
    assert jnp.allclose(out, ref32, rtol=5e-4, atol=5e-4), \
        f"f32 two-pass: max abs err {err}"

    # bf16 MXU-operand default path, checked against a bf16-conv reference.
    out16 = conv_block_forward(x, w_pt, bias, gamma, beta, kernel_size=K, stride=S)
    out16 = jax.block_until_ready(out16)
    assert out16.shape == (N, Cout, H, W)
    err16 = float(jnp.max(jnp.abs(out16 - ref16)))
    assert jnp.allclose(out16, ref16, rtol=5e-3, atol=5e-3), \
        f"bf16 fused: max abs err {err16}"

    print("KERNEL_OK")
</pallas_src>

<mosaic_0001>
module attributes {stable_mosaic.version = 11 : i64} {
  func.func @kernel(%arg0: i32, %arg1: memref<1x4x896xf32, #tpu.memory_space<vmem>>, %arg2: memref<8x36xf32, #tpu.memory_space<vmem>>, %arg3: memref<1x768xf32, #tpu.memory_space<vmem>>, %arg4: memref<8x1xf32, #tpu.memory_space<vmem>>, %arg5: memref<8x1xf32, #tpu.memory_space<vmem>>, %arg6: memref<8x768xf32, #tpu.memory_space<vmem>>, %arg7: memref<8x1xf32, #tpu.memory_space<vmem>>, %arg8: memref<8x1xf32, #tpu.memory_space<vmem>>) attributes {dimension_semantics = [#tpu.dimension_semantics<arbitrary>], iteration_bounds = array<i64: 1>, scalar_prefetch = 0 : i64, scratch_operands = 2 : i64, tpu.core_type = #tpu.core_type<tc>, window_params = [{transform_indices = @transform_0, window_bounds = array<i64: 1, 4, 896>}, {pipeline_mode = #tpu.pipeline_mode<synchronous>, transform_indices = @transform_1, window_bounds = array<i64: 8, 36>}, {transform_indices = @transform_2, window_bounds = array<i64: 1, 768>}, {pipeline_mode = #tpu.pipeline_mode<synchronous>, transform_indices = @transform_3, window_bounds = array<i64: 8, 1>}, {pipeline_mode = #tpu.pipeline_mode<synchronous>, transform_indices = @transform_4, window_bounds = array<i64: 8, 1>}, {pipeline_mode = #tpu.pipeline_mode<synchronous>, transform_indices = @transform_5, window_bounds = array<i64: 8, 768>}]} {
    %c0_i32 = arith.constant 0 : i32
    %0 = arith.cmpi eq, %arg0, %c0_i32 : i32
    %1 = arith.extui %0 : i1 to i32
    %c0_i32_0 = arith.constant 0 : i32
    %2 = arith.cmpi ne, %1, %c0_i32_0 : i32
    scf.if %2 {
      %cst_53 = arith.constant 0.000000e+00 : f32
      %68 = vector.broadcast %cst_53 : f32 to vector<8x1xf32>
      %c0_54 = arith.constant 0 : index
      %c0_55 = arith.constant 0 : index
      %69 = vector.load %arg7[%c0_54, %c0_55] : memref<8x1xf32, #tpu.memory_space<vmem>>, vector<8x1xf32>
      tpu.vector_store %arg7[%c0_54, %c0_55], %68 {strides = array<i32>} : memref<8x1xf32, #tpu.memory_space<vmem>>, vector<8x1xf32>,
      %cst_56 = arith.constant 0.000000e+00 : f32
      %70 = vector.broadcast %cst_56 : f32 to vector<8x1xf32>
      %c0_57 = arith.constant 0 : index
      %c0_58 = arith.constant 0 : index
      %71 = vector.load %arg8[%c0_57, %c0_58] : memref<8x1xf32, #tpu.memory_space<vmem>>, vector<8x1xf32>
      tpu.vector_store %arg8[%c0_57, %c0_58], %70 {strides = array<i32>} : memref<8x1xf32, #tpu.memory_space<vmem>>, vector<8x1xf32>,
    } else {
    }
    %c0 = arith.constant 0 : index
    %c0_1 = arith.constant 0 : index
    %3 = vector.load %arg2[%c0, %c0_1] : memref<8x36xf32, #tpu.memory_space<vmem>>, vector<8x4xf32>
    %c0_2 = arith.constant 0 : index
    %c0_3 = arith.constant 0 : index
    %c0_4 = arith.constant 0 : index
    %4 = vector.load %arg1[%c0_2, %c0_3, %c0_4] : memref<1x4x896xf32, #tpu.memory_space<vmem>>, vector<1x4x768xf32>
    %5 = vector.shape_cast %4 : vector<1x4x768xf32> to vector<4x768xf32>
    %cst = arith.constant dense<0.000000e+00> : vector<8x768xf32>
    %6 = tpu.matmul %3, %5, %cst {dimension_numbers = #tpu.dot_dimension_numbers<[1], [0], [0], [1], [0, 0, 1, 1], [], []>} : vector<8x4xf32>, vector<4x768xf32>, vector<8x768xf32> -> vector<8x768xf32>
    %c0_5 = arith.constant 0 : index
    %c4 = arith.constant 4 : index
    %7 = vector.load %arg2[%c0_5, %c4] : memref<8x36xf32, #tpu.memory_space<vmem>>, vector<8x4xf32>
    %c0_6 = arith.constant 0 : index
    %c0_7 = arith.constant 0 : index
    %c1 = arith.constant 1 : index
    %8 = vector.load %arg1[%c0_6, %c0_7, %c1] : memref<1x4x896xf32, #tpu.memory_space<vmem>>, vector<1x4x768xf32>
    %9 = vector.shape_cast %8 : vector<1x4x768xf32> to vector<4x768xf32>
    %cst_8 = arith.constant dense<0.000000e+00> : vector<8x768xf32>
    %10 = tpu.matmul %7, %9, %cst_8 {dimension_numbers = #tpu.dot_dimension_numbers<[1], [0], [0], [1], [0, 0, 1, 1], [], []>} : vector<8x4xf32>, vector<4x768xf32>, vector<8x768xf32> -> vector<8x768xf32>
    %11 = arith.addf %6, %10 : vector<8x768xf32>
    %c0_9 = arith.constant 0 : index
    %c8 = arith.constant 8 : index
    %12 = vector.load %arg2[%c0_9, %c8] : memref<8x36xf32, #tpu.memory_space<vmem>>, vector<8x4xf32>
    %c0_10 = arith.constant 0 : index
    %c0_11 = arith.constant 0 : index
    %c2 = arith.constant 2 : index
    %13 = vector.load %arg1[%c0_10, %c0_11, %c2] : memref<1x4x896xf32, #tpu.memory_space<vmem>>, vector<1x4x768xf32>
    %14 = vector.shape_cast %13 : vector<1x4x768xf32> to vector<4x768xf32>
    %cst_12 = arith.constant dense<0.000000e+00> : vector<8x768xf32>
    %15 = tpu.matmul %12, %14, %cst_12 {dimension_numbers = #tpu.dot_dimension_numbers<[1], [0], [0], [1], [0, 0, 1, 1], [], []>} : vector<8x4xf32>, vector<4x768xf32>, vector<8x768xf32> -> vector<8x768xf32>
    %16 = arith.addf %11, %15 : vector<8x768xf32>
    %c0_13 = arith.constant 0 : index
    %c12 = arith.constant 12 : index
    %17 = vector.load %arg2[%c0_13, %c12] : memref<8x36xf32, #tpu.memory_space<vmem>>, vector<8x4xf32>
    %c0_14 = arith.constant 0 : index
    %c0_15 = arith.constant 0 : index
    %c18 = arith.constant 18 : index
    %18 = vector.load %arg1[%c0_14, %c0_15, %c18] : memref<1x4x896xf32, #tpu.memory_space<vmem>>, vector<1x4x768xf32>
    %19 = vector.shape_cast %18 : vector<1x4x768xf32> to vector<4x768xf32>
    %cst_16 = arith.constant dense<0.000000e+00> : vector<8x768xf32>
    %20 = tpu.matmul %17, %19, %cst_16 {dimension_numbers = #tpu.dot_dimension_numbers<[1], [0], [0], [1], [0, 0, 1, 1], [], []>} : vector<8x4xf32>, vector<4x768xf32>, vector<8x768xf32> -> vector<8x768xf32>
    %21 = arith.addf %16, %20 : vector<8x768xf32>
    %c0_17 = arith.constant 0 : index
    %c16 = arith.constant 16 : index
    %22 = vector.load %arg2[%c0_17, %c16] : memref<8x36xf32, #tpu.memory_space<vmem>>, vector<8x4xf32>
    %c0_18 = arith.constant 0 : index
    %c0_19 = arith.constant 0 : index
    %c19 = arith.constant 19 : index
    %23 = vector.load %arg1[%c0_18, %c0_19, %c19] : memref<1x4x896xf32, #tpu.memory_space<vmem>>, vector<1x4x768xf32>
    %24 = vector.shape_cast %23 : vector<1x4x768xf32> to vector<4x768xf32>
    %cst_20 = arith.constant dense<0.000000e+00> : vector<8x768xf32>
    %25 = tpu.matmul %22, %24, %cst_20 {dimension_numbers = #tpu.dot_dimension_numbers<[1], [0], [0], [1], [0, 0, 1, 1], [], []>} : vector<8x4xf32>, vector<4x768xf32>, vector<8x768xf32> -> vector<8x768xf32>
    %26 = arith.addf %21, %25 : vector<8x768xf32>
    %c0_21 = arith.constant 0 : index
    %c20 = arith.constant 20 : index
    %27 = vector.load %arg2[%c0_21, %c20] : memref<8x36xf32, #tpu.memory_space<vmem>>, vector<8x4xf32>
    %c0_22 = arith.constant 0 : index
    %c0_23 = arith.constant 0 : index
    %c20_24 = arith.constant 20 : index
    %28 = vector.load %arg1[%c0_22, %c0_23, %c20_24] : memref<1x4x896xf32, #tpu.memory_space<vmem>>, vector<1x4x768xf32>
    %29 = vector.shape_cast %28 : vector<1x4x768xf32> to vector<4x768xf32>
    %cst_25 = arith.constant dense<0.000000e+00> : vector<8x768xf32>
    %30 = tpu.matmul %27, %29, %cst_25 {dimension_numbers = #tpu.dot_dimension_numbers<[1], [0], [0], [1], [0, 0, 1, 1], [], []>} : vector<8x4xf32>, vector<4x768xf32>, vector<8x768xf32> -> vector<8x768xf32>
    %31 = arith.addf %26, %30 : vector<8x768xf32>
    %c0_26 = arith.constant 0 : index
    %c24 = arith.constant 24 : index
    %32 = vector.load %arg2[%c0_26, %c24] : memref<8x36xf32, #tpu.memory_space<vmem>>, vector<8x4xf32>
    %c0_27 = arith.constant 0 : index
    %c0_28 = arith.constant 0 : index
    %c36 = arith.constant 36 : index
    %33 = vector.load %arg1[%c0_27, %c0_28, %c36] : memref<1x4x896xf32, #tpu.memory_space<vmem>>, vector<1x4x768xf32>
    %34 = vector.shape_cast %33 : vector<1x4x768xf32> to vector<4x768xf32>
    %cst_29 = arith.constant dense<0.000000e+00> : vector<8x768xf32>
    %35 = tpu.matmul %32, %34, %cst_29 {dimension_numbers = #tpu.dot_dimension_numbers<[1], [0], [0], [1], [0, 0, 1, 1], [], []>} : vector<8x4xf32>, vector<4x768xf32>, vector<8x768xf32> -> vector<8x768xf32>
    %36 = arith.addf %31, %35 : vector<8x768xf32>
    %c0_30 = arith.constant 0 : index
    %c28 = arith.constant 28 : index
    %37 = vector.load %arg2[%c0_30, %c28] : memref<8x36xf32, #tpu.memory_space<vmem>>, vector<8x4xf32>
    %c0_31 = arith.constant 0 : index
    %c0_32 = arith.constant 0 : index
    %c37 = arith.constant 37 : index
    %38 = vector.load %arg1[%c0_31, %c0_32, %c37] : memref<1x4x896xf32, #tpu.memory_space<vmem>>, vector<1x4x768xf32>
    %39 = vector.shape_cast %38 : vector<1x4x768xf32> to vector<4x768xf32>
    %cst_33 = arith.constant dense<0.000000e+00> : vector<8x768xf32>
    %40 = tpu.matmul %37, %39, %cst_33 {dimension_numbers = #tpu.dot_dimension_numbers<[1], [0], [0], [1], [0, 0, 1, 1], [], []>} : vector<8x4xf32>, vector<4x768xf32>, vector<8x768xf32> -> vector<8x768xf32>
    %41 = arith.addf %36, %40 : vector<8x768xf32>
    %c0_34 = arith.constant 0 : index
    %c32 = arith.constant 32 : index
    %42 = vector.load %arg2[%c0_34, %c32] : memref<8x36xf32, #tpu.memory_space<vmem>>, vector<8x4xf32>
    %c0_35 = arith.constant 0 : index
    %c0_36 = arith.constant 0 : index
    %c38 = arith.constant 38 : index
    %43 = vector.load %arg1[%c0_35, %c0_36, %c38] : memref<1x4x896xf32, #tpu.memory_space<vmem>>, vector<1x4x768xf32>
    %44 = vector.shape_cast %43 : vector<1x4x768xf32> to vector<4x768xf32>
    %cst_37 = arith.constant dense<0.000000e+00> : vector<8x768xf32>
    %45 = tpu.matmul %42, %44, %cst_37 {dimension_numbers = #tpu.dot_dimension_numbers<[1], [0], [0], [1], [0, 0, 1, 1], [], []>} : vector<8x4xf32>, vector<4x768xf32>, vector<8x768xf32> -> vector<8x768xf32>
    %46 = arith.addf %41, %45 : vector<8x768xf32>
    %c0_38 = arith.constant 0 : index
    %c0_39 = arith.constant 0 : index
    %47 = vector.load %arg3[%c0_38, %c0_39] : memref<1x768xf32, #tpu.memory_space<vmem>>, vector<1x768xf32>
    %48 = vector.broadcast %47 : vector<1x768xf32> to vector<8x768xf32>
    %49 = arith.mulf %46, %48 : vector<8x768xf32>
    %c768_i32 = arith.constant 768 : i32
    %50 = arith.muli %arg0, %c768_i32 : i32
    %51 = tpu.assume_multiple %50, 768 : i32
    %c0_40 = arith.constant 0 : index
    %52 = arith.index_cast %51 : i32 to index
    %53 = vector.load %arg6[%c0_40, %52] : memref<8x768xf32, #tpu.memory_space<vmem>>, vector<8x768xf32>
    tpu.vector_store %arg6[%c0_40, %52], %49 {strides = array<i32>} : memref<8x768xf32, #tpu.memory_space<vmem>>, vector<8x768xf32>,
    %c0_41 = arith.constant 0 : index
    %c0_42 = arith.constant 0 : index
    %54 = vector.load %arg7[%c0_41, %c0_42] : memref<8x1xf32, #tpu.memory_space<vmem>>, vector<8x1xf32>
    %cst_43 = arith.constant dense<0.000000e+00> : vector<8xf32>
    %55 = vector.multi_reduction <add>, %49, %cst_43 [1] : vector<8x768xf32> to vector<8xf32>
    %56 = vector.shape_cast %55 : vector<8xf32> to vector<8x1xf32>
    %57 = arith.addf %54, %56 : vector<8x1xf32>
    %c0_44 = arith.constant 0 : index
    %c0_45 = arith.constant 0 : index
    %58 = vector.load %arg7[%c0_44, %c0_45] : memref<8x1xf32, #tpu.memory_space<vmem>>, vector<8x1xf32>
    tpu.vector_store %arg7[%c0_44, %c0_45], %57 {strides = array<i32>} : memref<8x1xf32, #tpu.memory_space<vmem>>, vector<8x1xf32>,
    %c0_46 = arith.constant 0 : index
    %c0_47 = arith.constant 0 : index
    %59 = vector.load %arg8[%c0_46, %c0_47] : memref<8x1xf32, #tpu.memory_space<vmem>>, vector<8x1xf32>
    %60 = arith.mulf %49, %49 : vector<8x768xf32>
    %cst_48 = arith.constant dense<0.000000e+00> : vector<8xf32>
    %61 = vector.multi_reduction <add>, %60, %cst_48 [1] : vector<8x768xf32> to vector<8xf32>
    %62 = vector.shape_cast %61 : vector<8xf32> to vector<8x1xf32>
    %63 = arith.addf %59, %62 : vector<8x1xf32>
    %c0_49 = arith.constant 0 : index
    %c0_50 = arith.constant 0 : index
    %64 = vector.load %arg8[%c0_49, %c0_50] : memref<8x1xf32, #tpu.memory_space<vmem>>, vector<8x1xf32>
    tpu.vector_store %arg8[%c0_49, %c0_50], %63 {strides = array<i32>} : memref<8x1xf32, #tpu.memory_space<vmem>>, vector<8x1xf32>,
    %c0_i32_51 = arith.constant 0 : i32
    %65 = arith.cmpi eq, %arg0, %c0_i32_51 : i32
    %66 = arith.extui %65 : i1 to i32
    %c0_i32_52 = arith.constant 0 : i32
    %67 = arith.cmpi ne, %66, %c0_i32_52 : i32
    scf.if %67 {
      %c0_53 = arith.constant 0 : index
      %c0_54 = arith.constant 0 : index
      %68 = vector.load %arg7[%c0_53, %c0_54] : memref<8x1xf32, #tpu.memory_space<vmem>>, vector<8x1xf32>
      %cst_55 = arith.constant 0.001953125 : f32
      %69 = vector.broadcast %cst_55 : f32 to vector<8x1xf32>
      %70 = arith.mulf %68, %69 : vector<8x1xf32>
      %c0_56 = arith.constant 0 : index
      %c0_57 = arith.constant 0 : index
      %71 = vector.load %arg8[%c0_56, %c0_57] : memref<8x1xf32, #tpu.memory_space<vmem>>, vector<8x1xf32>
      %cst_58 = arith.constant 0.001953125 : f32
      %72 = vector.broadcast %cst_58 : f32 to vector<8x1xf32>
      %73 = arith.mulf %71, %72 : vector<8x1xf32>
      %74 = arith.mulf %70, %70 : vector<8x1xf32>
      %75 = arith.subf %73, %74 : vector<8x1xf32>
      %cst_59 = arith.constant 9.99999974E-6 : f32
      %76 = vector.broadcast %cst_59 : f32 to vector<8x1xf32>
      %77 = arith.addf %75, %76 : vector<8x1xf32>
      %78 = math.rsqrt %77 : vector<8x1xf32>
      %c0_60 = arith.constant 0 : index
      %c0_61 = arith.constant 0 : index
      %79 = vector.load %arg4[%c0_60, %c0_61] : memref<8x1xf32, #tpu.memory_space<vmem>>, vector<8x1xf32>
      %80 = arith.mulf %79, %78 : vector<8x1xf32>
      %c0_62 = arith.constant 0 : index
      %c0_63 = arith.constant 0 : index
      %81 = vector.load %arg5[%c0_62, %c0_63] : memref<8x1xf32, #tpu.memory_space<vmem>>, vector<8x1xf32>
      %82 = arith.mulf %70, %80 : vector<8x1xf32>
      %83 = arith.subf %81, %82 : vector<8x1xf32>
      %c0_64 = arith.constant 0 : index
      %c0_65 = arith.constant 0 : index
      %84 = vector.load %arg6[%c0_64, %c0_65] : memref<8x768xf32, #tpu.memory_space<vmem>>, vector<8x768xf32>
      %85 = vector.broadcast %80 : vector<8x1xf32> to vector<8x768xf32>
      %86 = arith.mulf %84, %85 : vector<8x768xf32>
      %87 = vector.broadcast %83 : vector<8x1xf32> to vector<8x768xf32>
      %88 = arith.addf %86, %87 : vector<8x768xf32>
      %cst_66 = arith.constant 0.000000e+00 : f32
      %89 = vector.broadcast %cst_66 : f32 to vector<8x768xf32>
      %90 = arith.maximumf %88, %89 : vector<8x768xf32>
      %c0_67 = arith.constant 0 : index
      %c0_68 = arith.constant 0 : index
      %91 = vector.load %arg6[%c0_67, %c0_68] : memref<8x768xf32, #tpu.memory_space<vmem>>, vector<8x768xf32>
      tpu.vector_store %arg6[%c0_67, %c0_68], %90 {strides = array<i32>} : memref<8x768xf32, #tpu.memory_space<vmem>>, vector<8x768xf32>,
    } else {
    }
    return
  }
  func.func @transform_0(%arg0: i32) -> (i32, i32, i32) {
    %c0_i32 = arith.constant 0 : i32
    %c0_i32_0 = arith.constant 0 : i32
    %c0_i32_1 = arith.constant 0 : i32
    return %arg0, %c0_i32, %c0_i32_0 : i32, i32, i32
  }
  func.func @transform_1(%arg0: i32) -> (i32, i32) {
    %c0_i32 = arith.constant 0 : i32
    %c0_i32_0 = arith.constant 0 : i32
    %c0_i32_1 = arith.constant 0 : i32
    return %c0_i32, %c0_i32_0 : i32, i32
  }
  func.func @transform_2(%arg0: i32) -> (i32, i32) {
    %c0_i32 = arith.constant 0 : i32
    %c0_i32_0 = arith.constant 0 : i32
    return %c0_i32, %arg0 : i32, i32
  }
  func.func @transform_3(%arg0: i32) -> (i32, i32) {
    %c0_i32 = arith.constant 0 : i32
    %c0_i32_0 = arith.constant 0 : i32
    %c0_i32_1 = arith.constant 0 : i32
    return %c0_i32, %c0_i32_0 : i32, i32
  }
  func.func @transform_4(%arg0: i32) -> (i32, i32) {
    %c0_i32 = arith.constant 0 : i32
    %c0_i32_0 = arith.constant 0 : i32
    %c0_i32_1 = arith.constant 0 : i32
    return %c0_i32, %c0_i32_0 : i32, i32
  }
  func.func @transform_5(%arg0: i32) -> (i32, i32) {
    %c0_i32 = arith.constant 0 : i32
    %c0_i32_0 = arith.constant 0 : i32
    %c0_i32_1 = arith.constant 0 : i32
    return %c0_i32, %c0_i32_0 : i32, i32
  }
}

</mosaic_0001>

<bundles_post_ra>
// kernel: tpu_custom_call.1
= control target key start
LH: loop header
LB: loop body
LE: loop exit
PB: predicated region body
PF: predicated region fallthrough
CT: control target
= control target key end

     0   :  { %10 = vsyncpa [#allocation5], 0  ;;  %s3061_s0 = inlined_call_operand.hbm [shape: f32[1,4,896], index: 0, kind: input, shape index: {}]   ;;  %s3062_s1 = inlined_call_operand.vmem [shape: f32[8,36], index: 1, kind: input, shape index: {}]   ;;  %s3063_s2 = inlined_call_operand.vmem [shape: f32[1,768], index: 2, kind: input, shape index: {}]   ;;  %s3064_s3 = inlined_call_operand.vmem [shape: f32[8,1], index: 3, kind: input, shape index: {}]   ;;  %s3065_s4 = inlined_call_operand.vmem [shape: f32[8,1], index: 4, kind: input, shape index: {}]   ;;  %s3066_s5 = inlined_call_operand.hbm [shape: f32[8,768], index: 5, kind: output, shape index: {}]  }
   0x1   :  { %11 = vsyncpa [#allocation6], 0  ;;  %s2724_s18 = smov [#allocation4]  }
   0x2   :  { %s18_s19 = sshll.u32 %s2724_s18, 4  ;;  %s19_s19 = int_to_ptr.vmem [resolvable:$true] %s18_s19 }
   0x3   :  { %s2688_s20 = scalar_lea.vmem %s19_s19, 448  ;;  %p2693_p1 = scmp.lt.s32.totalorder %s19_s19, %s19_s19 }
   0x4   :  { %p2689_p0 = scmp.ne.s32.totalorder %s19_s19, %s2688_s20  ;;  %p2694_p2 = scmp.lt.s32.totalorder %s2688_s20, %s2688_s20 }
   0x6   :  { %p2695_p3 = por %p2694_p2, %p2693_p1 }
   0x8   :  { %p2696_p4 = pnand %p2695_p3, %p2689_p0 }
   0xa   :  { %2699 = shalt.err (!%p2696_p4)
}
   0xb   :  { %21 = dma.hbm_to_vmem [thread:$0]  %s3061_s0, 448, %s19_s19, [#allocation5]  }
   0xc   :  { %2720 = dma.done.wait [#allocation5], 448  }
   0xd   :  { %2721 = vsyncadd [#allocation5], 4294966848  ;;  %v2725_v0 = vmov 0.0   ;;  %v2778_v1 = vld [vmem:[#allocation4 + $0x8] sm:$0xff]  ;;  %v2780_v2 = vld [vmem:[#allocation4] sm:$0xff]  ;;  %s2726_s23 = smov 127  }
   0xe   :  { %159 = vmatprep.mubr.f32.mxu0 %v2725_v0  ;;  %230 = vmatprep.mubr.f32.mxu1 %v2725_v0  ;;  %v2786_v3 = vcombine.high %v2780_v2, %v2780_v2  ;;  %v2791_v4 = vld [vmem:[%s3062_s1] sm:$0xff]  ;;  %v2795_v5 = vcombine.high %v2778_v1, %v2778_v1  ;;  %s2727_s25 = smov 124   ;;  %v47_v8 = vld [vmem:[#allocation4 + $0x18] sm:$0xf]  ;;  %s2728_s1 = smov 126   ;;  %vm72_vm0 = vcmask 1039360  }
   0xf   :  { %62 = vrot.lane.b32.xlu0 %v2778_v1, %s2726_s23  ;;  %58 = vrot.lane.b32.xlu1 %v2780_v2, %s2726_s23  ;;  %v2799_v6 = vld [vmem:[#allocation4 + $0x10] sm:$0xff]  ;;  %s2729_s26 = smov 120   ;;  %v545_v9 = vld [vmem:[#allocation4 + $0x18] sm:$0xf]  ;;  %s2730_s27 = smov 110   ;;  %vm82_vm1 = vcmask 1043456  }
  0x10   :  { %v2804_v7 = vcombine.high %v2799_v6, %v2799_v6  ;;  %s2731_s28 = smov 116   ;;  %v814_v10 = vld [vmem:[#allocation4 + $0x18] sm:$0xf]  ;;  %s2732_s29 = smov 109   ;;  %vm79_vm2 = vcmask 31744   ;;  %vm570_vm3 = vcmask 1031168  }
  0x11   :  { %s2733_s30 = smov 112   ;;  %v1083_v11 = vld [vmem:[#allocation4 + $0x18] sm:$0xf]  ;;  %s2734_s6 = smov 108   ;;  %vm839_vm4 = vcmask 900096   ;;  %vm1108_vm5 = vcmask 891904  }
  0x12   :  { %v1352_v12 = vld [vmem:[#allocation4 + $0x18] sm:$0xf]  ;;  %s2735_s7 = smov 92   ;;  %s2736_s8 = smov 104   ;;  %vm1377_vm6 = vcmask 883712   ;;  %vm1646_vm7 = vcmask 752640  }
  0x13   :  { %60 = vrot.lane.b32.xlu0 %v2786_v3, %s2726_s23  ;;  %49 = vrot.lane.b32.xlu1 %v2791_v4, %s2727_s25  ;;  %v1621_v13 = vld [vmem:[#allocation4 + $0x18] sm:$0xf]  ;;  %s2737_s9 = smov 91   ;;  %s2738_s10 = smov 100   ;;  %vm1915_vm8 = vcmask 744448   ;;  %vm2184_vm9 = vcmask 736256  }
  0x14   :  { %v1890_v14 = vld [vmem:[#allocation4 + $0x18] sm:$0xf]  ;;  %s2739_s11 = smov 90   ;;  %s2740_s12 = smov 96   ;;  %vm37_vm10 = vcmask 7168  }
  0x15   :  { %v2159_v23 = vld [vmem:[#allocation4 + $0x18] sm:$0xf]  ;;  %38 = vst.msk [vmem:[#allocation2] sm:$0xff] %vm37_vm10, %v2725_v0  ;;  %39 = vst.msk [vmem:[#allocation3] sm:$0xff] %vm37_vm10, %v2725_v0 }
  0x17   :  { %64 = vrot.lane.b32.xlu0 %v2795_v5, %s2726_s23  ;;  %66 = vrot.lane.b32.xlu1 %v2799_v6, %s2726_s23 }
  0x1b   :  { %68 = vrot.lane.b32.xlu0 %v2804_v7, %s2726_s23  ;;  %70 = vrot.lane.b32.xlu1 %v47_v8, %s2726_s23 }
  0x1f   :  { %558 = vrot.lane.b32.xlu0 %v2786_v3, %s2728_s1  ;;  %560 = vrot.lane.b32.xlu1 %v2778_v1, %s2728_s1 }
  0x23   :  { %556 = vrot.lane.b32.xlu0 %v2780_v2, %s2728_s1  ;;  %547 = vrot.lane.b32.xlu1 %v2791_v4, %s2729_s26 }
  0x27   :  { %562 = vrot.lane.b32.xlu0 %v2795_v5, %s2728_s1  ;;  %564 = vrot.lane.b32.xlu1 %v2799_v6, %s2728_s1 }
  0x2b   :  { %566 = vrot.lane.b32.xlu0 %v2804_v7, %s2728_s1  ;;  %568 = vrot.lane.b32.xlu1 %v545_v9, %s2728_s1 }
  0x2f   :  { %827 = vrot.lane.b32.xlu0 %v2786_v3, %s2730_s27  ;;  %829 = vrot.lane.b32.xlu1 %v2778_v1, %s2730_s27 }
  0x33   :  { %831 = vrot.lane.b32.xlu0 %v2795_v5, %s2730_s27  ;;  %833 = vrot.lane.b32.xlu1 %v2799_v6, %s2730_s27 }
  0x37   :  { %825 = vrot.lane.b32.xlu0 %v2780_v2, %s2730_s27  ;;  %816 = vrot.lane.b32.xlu1 %v2791_v4, %s2731_s28 }
  0x3b   :  { %835 = vrot.lane.b32.xlu0 %v2804_v7, %s2730_s27  ;;  %837 = vrot.lane.b32.xlu1 %v814_v10, %s2730_s27 }
  0x3f   :  { %1096 = vrot.lane.b32.xlu0 %v2786_v3, %s2732_s29  ;;  %1098 = vrot.lane.b32.xlu1 %v2778_v1, %s2732_s29 }
  0x43   :  { %1094 = vrot.lane.b32.xlu0 %v2780_v2, %s2732_s29  ;;  %1085 = vrot.lane.b32.xlu1 %v2791_v4, %s2733_s30 }
  0x47   :  { %1100 = vrot.lane.b32.xlu0 %v2795_v5, %s2732_s29  ;;  %1102 = vrot.lane.b32.xlu1 %v2799_v6, %s2732_s29 }
  0x4b   :  { %1104 = vrot.lane.b32.xlu0 %v2804_v7, %s2732_s29  ;;  %1106 = vrot.lane.b32.xlu1 %v1083_v11, %s2732_s29 }
  0x4f   :  { %1365 = vrot.lane.b32.xlu0 %v2786_v3, %s2734_s6  ;;  %1367 = vrot.lane.b32.xlu1 %v2778_v1, %s2734_s6 }
  0x53   :  { %1369 = vrot.lane.b32.xlu0 %v2795_v5, %s2734_s6  ;;  %1371 = vrot.lane.b32.xlu1 %v2799_v6, %s2734_s6 }
  0x57   :  { %1363 = vrot.lane.b32.xlu0 %v2780_v2, %s2734_s6  ;;  %1354 = vrot.lane.b32.xlu1 %v2791_v4, %s2734_s6 }
  0x5b   :  { %1373 = vrot.lane.b32.xlu0 %v2804_v7, %s2734_s6  ;;  %1375 = vrot.lane.b32.xlu1 %v1352_v12, %s2734_s6 }
  0x5f   :  { %1634 = vrot.lane.b32.xlu0 %v2786_v3, %s2735_s7  ;;  %1636 = vrot.lane.b32.xlu1 %v2778_v1, %s2735_s7 }
  0x63   :  { %1632 = vrot.lane.b32.xlu0 %v2780_v2, %s2735_s7  ;;  %1623 = vrot.lane.b32.xlu1 %v2791_v4, %s2736_s8 }
  0x67   :  { %1638 = vrot.lane.b32.xlu0 %v2795_v5, %s2735_s7  ;;  %1640 = vrot.lane.b32.xlu1 %v2799_v6, %s2735_s7 }
  0x6b   :  { %1642 = vrot.lane.b32.xlu0 %v2804_v7, %s2735_s7  ;;  %1644 = vrot.lane.b32.xlu1 %v1621_v13, %s2735_s7 }
  0x6f   :  { %1903 = vrot.lane.b32.xlu0 %v2786_v3, %s2737_s9  ;;  %1905 = vrot.lane.b32.xlu1 %v2778_v1, %s2737_s9 }
  0x73   :  { %1907 = vrot.lane.b32.xlu0 %v2795_v5, %s2737_s9  ;;  %1909 = vrot.lane.b32.xlu1 %v2799_v6, %s2737_s9 }
  0x77   :  { %1901 = vrot.lane.b32.xlu0 %v2780_v2, %s2737_s9  ;;  %1892 = vrot.lane.b32.xlu1 %v2791_v4, %s2738_s10 }
  0x7b   :  { %1911 = vrot.lane.b32.xlu0 %v2804_v7, %s2737_s9  ;;  %1913 = vrot.lane.b32.xlu1 %v1890_v14, %s2737_s9 }
  0x7f   :  { %2172 = vrot.lane.b32.xlu0 %v2786_v3, %s2739_s11  ;;  %2174 = vrot.lane.b32.xlu1 %v2778_v1, %s2739_s11 }
  0x81   :  { %v63_v15 = vpop.permute.xlu0 %62  ;;  %v59_v16 = vpop.permute.xlu1 %58 }
  0x83   :  { %2170 = vrot.lane.b32.xlu0 %v2780_v2, %s2739_s11  ;;  %2161 = vrot.lane.b32.xlu1 %v2791_v4, %s2740_s12 }
  0x85   :  { %v61_v17 = vpop.permute.xlu0 %60  ;;  %v50_v18 = vpop.permute.xlu1 %49 }
  0x86   :  { %v74_v19 = vsel %vm72_vm0, %v61_v17, %v63_v15  ;;  %v73_v20 = vsel %vm72_vm0, %v59_v16, %v61_v17 }
  0x87   :  { %2176 = vrot.lane.b32.xlu0 %v2795_v5, %s2739_s11  ;;  %2573 = vmatprep.subr.msk.mxu0 %vm82_vm1, %v74_v19 }
  0x88   :  { %2178 = vrot.lane.b32.xlu1 %v2799_v6, %s2739_s11  ;;  %2574 = vmatpush1.msk.msra.mxu0 %vm82_vm1, %v73_v20 }
  0x89   :  { %v65_v21 = vpop.permute.xlu0 %64  ;;  %2575 = vmatmul.mubr.msk.f32.vlgmr.msra.gmra.mxu0 %vm79_vm2, %v50_v18  ;;  %v67_v22 = vpop.permute.xlu1 %66 }
  0x8a   :  { %v76_v24 = vsel %vm72_vm0, %v65_v21, %v67_v22  ;;  %v75_v25 = vsel %vm72_vm0, %v63_v15, %v65_v21  ;;  %301 = vmatprep.mubr.f32.mxu0 %v2725_v0 }
  0x8b   :  { %2180 = vrot.lane.b32.xlu0 %v2804_v7, %s2739_s11  ;;  %2576 = vmatprep.subr.msk.mxu1 %vm82_vm1, %v76_v24 }
  0x8c   :  { %2182 = vrot.lane.b32.xlu1 %v2159_v23, %s2739_s11  ;;  %2577 = vmatpush1.msk.msra.mxu1 %vm82_vm1, %v75_v25 }
  0x8d   :  { %v69_v26 = vpop.permute.xlu0 %68  ;;  %2578 = vmatmul.mubr.msk.f32.vlgmr.msra.gmra.mxu1 %vm79_vm2, %v50_v18  ;;  %v71_v27 = vpop.permute.xlu1 %70  ;;  %2582 = vmatprep.subr.msk.mxu1 %vm82_vm1, %v2786_v3 }
  0x8e   :  { %v77_v28 = vsel %vm72_vm0, %v67_v22, %v69_v26  ;;  %v78_v29 = vsel %vm72_vm0, %v69_v26, %v71_v27  ;;  %2583 = vmatpush1.msk.msra.mxu1 %vm82_vm1, %v2780_v2  ;;  %392 = vmatprep.mubr.f32.mxu1 %v2725_v0 }
  0x8f   :  { %2579 = vmatprep.subr.msk.mxu0 %vm82_vm1, %v78_v29  ;;  %2588 = vmatprep.subr.msk.mxu1 %vm82_vm1, %v2804_v7 }
  0x90   :  { %2580 = vmatpush1.msk.msra.mxu0 %vm82_vm1, %v77_v28 }
  0x91   :  { %v559_v30 = vpop.permute.xlu0 %558  ;;  %2581 = vmatmul.mubr.msk.f32.vlgmr.msra.gmra.mxu0 %vm79_vm2, %v50_v18  ;;  %2584 = vmatmul.mubr.msk.f32.vlgmr.msra.gmra.mxu1 %vm79_vm2, %v2791_v4  ;;  %v561_v31 = vpop.permute.xlu1 %560 }
  0x92   :  { %2585 = vmatprep.subr.msk.mxu0 %vm82_vm1, %v2795_v5  ;;  %v572_v32 = vsel %vm570_vm3, %v559_v30, %v561_v31  ;;  %463 = vmatprep.mubr.f32.mxu0 %v2725_v0 }
  0x93   :  { %2586 = vmatpush1.msk.msra.mxu0 %vm82_vm1, %v2778_v1  ;;  %2589 = vmatpush1.msk.msra.mxu1 %vm82_vm1, %v2799_v6 }
  0x94   :  { %2591 = vmatprep.subr.msk.mxu0 %vm82_vm1, %v572_v32  ;;  %534 = vmatprep.mubr.f32.mxu1 %v2725_v0 }
  0x95   :  { %v557_v33 = vpop.permute.xlu0 %556  ;;  %2587 = vmatmul.mubr.msk.f32.vlgmr.msra.gmra.mxu0 %vm79_vm2, %v2791_v4  ;;  %2590 = vmatmul.mubr.msk.f32.vlgmr.msra.gmra.mxu1 %vm79_vm2, %v2791_v4  ;;  %v548_v34 = vpop.permute.xlu1 %547 }
  0x96   :  { %v571_v35 = vsel %vm570_vm3, %v557_v33, %v559_v30  ;;  %655 = vmatprep.mubr.f32.mxu0 %v2725_v0  ;;  %726 = vmatprep.mubr.f32.mxu1 %v2725_v0 }
  0x97   :  { %2592 = vmatpush1.msk.msra.mxu0 %vm82_vm1, %v571_v35 }
  0x99   :  { %v563_v36 = vpop.permute.xlu0 %562  ;;  %2593 = vmatmul.mubr.msk.f32.vlgmr.msra.gmra.mxu0 %vm79_vm2, %v548_v34  ;;  %v565_v37 = vpop.permute.xlu1 %564 }
  0x9a   :  { %v573_v38 = vsel %vm570_vm3, %v561_v31, %v563_v36  ;;  %v574_v39 = vsel %vm570_vm3, %v563_v36, %v565_v37  ;;  %797 = vmatprep.mubr.f32.mxu0 %v2725_v0 }
  0x9b   :  { %2594 = vmatprep.subr.msk.mxu1 %vm82_vm1, %v574_v39 }
  0x9c   :  { %2595 = vmatpush1.msk.msra.mxu1 %vm82_vm1, %v573_v38 }
  0x9d   :  { %v567_v40 = vpop.permute.xlu0 %566  ;;  %2596 = vmatmul.mubr.msk.f32.vlgmr.msra.gmra.mxu1 %vm79_vm2, %v548_v34  ;;  %v569_v41 = vpop.permute.xlu1 %568 }
  0x9e   :  { %v575_v42 = vsel %vm570_vm3, %v565_v37, %v567_v40  ;;  %v576_v43 = vsel %vm570_vm3, %v567_v40, %v569_v41  ;;  %924 = vmatprep.mubr.f32.mxu1 %v2725_v0 }
  0x9f   :  { %2597 = vmatprep.subr.msk.mxu0 %vm82_vm1, %v576_v43 }
  0xa0   :  { %2598 = vmatpush1.msk.msra.mxu0 %vm82_vm1, %v575_v42 }
  0xa1   :  { %v828_v44 = vpop.permute.xlu0 %827  ;;  %2599 = vmatmul.mubr.msk.f32.vlgmr.msra.gmra.mxu0 %vm79_vm2, %v548_v34  ;;  %v830_v45 = vpop.permute.xlu1 %829 }
  0xa2   :  { %v841_v46 = vsel %vm839_vm4, %v828_v44, %v830_v45  ;;  %995 = vmatprep.mubr.f32.mxu0 %v2725_v0 }
  0xa3   :  { %2600 = vmatprep.subr.msk.mxu1 %vm82_vm1, %v841_v46 }
  0xa5   :  { %v832_v47 = vpop.permute.xlu0 %831  ;;  %v834_v48 = vpop.permute.xlu1 %833 }
  0xa6   :  { %v842_v49 = vsel %vm839_vm4, %v830_v45, %v832_v47  ;;  %v843_v50 = vsel %vm839_vm4, %v832_v47, %v834_v48 }
  0xa7   :  { %2603 = vmatprep.subr.msk.mxu0 %vm82_vm1, %v843_v50 }
  0xa8   :  { %2604 = vmatpush1.msk.msra.mxu0 %vm82_vm1, %v842_v49 }
  0xa9   :  { %v826_v51 = vpop.permute.xlu0 %825  ;;  %v817_v52 = vpop.permute.xlu1 %816 }
  0xaa   :  { %v840_v53 = vsel %vm839_vm4, %v826_v51, %v828_v44  ;;  %2605 = vmatmul.mubr.msk.f32.vlgmr.msra.gmra.mxu0 %vm79_vm2, %v817_v52 }
  0xab   :  { %2601 = vmatpush1.msk.msra.mxu1 %vm82_vm1, %v840_v53  ;;  %1193 = vmatprep.mubr.f32.mxu0 %v2725_v0 }
  0xac   :  { %2602 = vmatmul.mubr.msk.f32.vlgmr.msra.gmra.mxu1 %vm79_vm2, %v817_v52 }
  0xad   :  { %v836_v54 = vpop.permute.xlu0 %835  ;;  %v838_v55 = vpop.permute.xlu1 %837  ;;  %1066 = vmatprep.mubr.f32.mxu1 %v2725_v0 }
  0xae   :  { %v844_v56 = vsel %vm839_vm4, %v834_v48, %v836_v54  ;;  %v845_v57 = vsel %vm839_vm4, %v836_v54, %v838_v55 }
  0xaf   :  { %2606 = vmatprep.subr.msk.mxu1 %vm82_vm1, %v845_v57 }
  0xb0   :  { %2607 = vmatpush1.msk.msra.mxu1 %vm82_vm1, %v844_v56 }
  0xb1   :  { %v1097_v58 = vpop.permute.xlu0 %1096  ;;  %2608 = vmatmul.mubr.msk.f32.vlgmr.msra.gmra.mxu1 %vm79_vm2, %v817_v52  ;;  %v1099_v59 = vpop.permute.xlu1 %1098 }
  0xb2   :  { %v1110_v60 = vsel %vm1108_vm5, %v1097_v58, %v1099_v59  ;;  %1264 = vmatprep.mubr.f32.mxu1 %v2725_v0 }
  0xb3   :  { %2609 = vmatprep.subr.msk.mxu0 %vm82_vm1, %v1110_v60 }
  0xb5   :  { %v1095_v61 = vpop.permute.xlu0 %1094  ;;  %v1086_v62 = vpop.permute.xlu1 %1085 }
  0xb6   :  { %v1109_v63 = vsel %vm1108_vm5, %v1095_v61, %v1097_v58 }
  0xb7   :  { %2610 = vmatpush1.msk.msra.mxu0 %vm82_vm1, %v1109_v63 }
  0xb8   :  { %2611 = vmatmul.mubr.msk.f32.vlgmr.msra.gmra.mxu0 %vm79_vm2, %v1086_v62 }
  0xb9   :  { %v1101_v1 = vpop.permute.xlu0 %1100  ;;  %v1103_v2 = vpop.permute.xlu1 %1102  ;;  %1335 = vmatprep.mubr.f32.mxu0 %v2725_v0 }
  0xba   :  { %v1111_v3 = vsel %vm1108_vm5, %v1099_v59, %v1101_v1  ;;  %v1112_v4 = vsel %vm1108_vm5, %v1101_v1, %v1103_v2 }
  0xbb   :  { %2612 = vmatprep.subr.msk.mxu1 %vm82_vm1, %v1112_v4 }
  0xbc   :  { %2613 = vmatpush1.msk.msra.mxu1 %vm82_vm1, %v1111_v3 }
  0xbd   :  { %v1105_v5 = vpop.permute.xlu0 %1104  ;;  %2614 = vmatmul.mubr.msk.f32.vlgmr.msra.gmra.mxu1 %vm79_vm2, %v1086_v62  ;;  %v1107_v6 = vpop.permute.xlu1 %1106 }
  0xbe   :  { %v1113_v7 = vsel %vm1108_vm5, %v1103_v2, %v1105_v5  ;;  %v1114_v8 = vsel %vm1108_vm5, %v1105_v5, %v1107_v6  ;;  %1462 = vmatprep.mubr.f32.mxu1 %v2725_v0 }
  0xbf   :  { %2615 = vmatprep.subr.msk.mxu0 %vm82_vm1, %v1114_v8 }
  0xc0   :  { %2616 = vmatpush1.msk.msra.mxu0 %vm82_vm1, %v1113_v7 }
  0xc1   :  { %v1366_v9 = vpop.permute.xlu0 %1365  ;;  %2617 = vmatmul.mubr.msk.f32.vlgmr.msra.gmra.mxu0 %vm79_vm2, %v1086_v62  ;;  %v1368_v10 = vpop.permute.xlu1 %1367 }
  0xc2   :  { %v1379_v11 = vsel %vm1377_vm6, %v1366_v9, %v1368_v10  ;;  %1533 = vmatprep.mubr.f32.mxu0 %v2725_v0 }
  0xc3   :  { %2618 = vmatprep.subr.msk.mxu1 %vm82_vm1, %v1379_v11 }
  0xc5   :  { %v1370_v12 = vpop.permute.xlu0 %1369  ;;  %v1372_v13 = vpop.permute.xlu1 %1371 }
  0xc6   :  { %v1380_v14 = vsel %vm1377_vm6, %v1368_v10, %v1370_v12  ;;  %v1381_v15 = vsel %vm1377_vm6, %v1370_v12, %v1372_v13 }
  0xc7   :  { %2621 = vmatprep.subr.msk.mxu0 %vm82_vm1, %v1381_v15 }
  0xc8   :  { %2622 = vmatpush1.msk.msra.mxu0 %vm82_vm1, %v1380_v14 }
  0xc9   :  { %v1364_v16 = vpop.permute.xlu0 %1363  ;;  %v1355_v17 = vpop.permute.xlu1 %1354 }
  0xca   :  { %v1378_v18 = vsel %vm1377_vm6, %v1364_v16, %v1366_v9  ;;  %2623 = vmatmul.mubr.msk.f32.vlgmr.msra.gmra.mxu0 %vm79_vm2, %v1355_v17 }
  0xcb   :  { %2619 = vmatpush1.msk.msra.mxu1 %vm82_vm1, %v1378_v18  ;;  %1731 = vmatprep.mubr.f32.mxu0 %v2725_v0 }
  0xcc   :  { %2620 = vmatmul.mubr.msk.f32.vlgmr.msra.gmra.mxu1 %vm79_vm2, %v1355_v17 }
  0xcd   :  { %v1374_v19 = vpop.permute.xlu0 %1373  ;;  %v1376_v20 = vpop.permute.xlu1 %1375  ;;  %1604 = vmatprep.mubr.f32.mxu1 %v2725_v0 }
  0xce   :  { %v1382_v21 = vsel %vm1377_vm6, %v1372_v13, %v1374_v19  ;;  %v1383_v22 = vsel %vm1377_vm6, %v1374_v19, %v1376_v20 }
  0xcf   :  { %2624 = vmatprep.subr.msk.mxu1 %vm82_vm1, %v1383_v22 }
  0xd0   :  { %2625 = vmatpush1.msk.msra.mxu1 %vm82_vm1, %v1382_v21 }
  0xd1   :  { %v1635_v23 = vpop.permute.xlu0 %1634  ;;  %2626 = vmatmul.mubr.msk.f32.vlgmr.msra.gmra.mxu1 %vm79_vm2, %v1355_v17  ;;  %v1637_v24 = vpop.permute.xlu1 %1636 }
  0xd2   :  { %v1648_v25 = vsel %vm1646_vm7, %v1635_v23, %v1637_v24  ;;  %1802 = vmatprep.mubr.f32.mxu1 %v2725_v0 }
  0xd3   :  { %2627 = vmatprep.subr.msk.mxu0 %vm82_vm1, %v1648_v25 }
  0xd5   :  { %v1633_v26 = vpop.permute.xlu0 %1632  ;;  %v1624_v27 = vpop.permute.xlu1 %1623 }
  0xd6   :  { %v1647_v28 = vsel %vm1646_vm7, %v1633_v26, %v1635_v23 }
  0xd7   :  { %2628 = vmatpush1.msk.msra.mxu0 %vm82_vm1, %v1647_v28 }
  0xd8   :  { %2629 = vmatmul.mubr.msk.f32.vlgmr.msra.gmra.mxu0 %vm79_vm2, %v1624_v27 }
  0xd9   :  { %v1639_v29 = vpop.permute.xlu0 %1638  ;;  %v1641_v30 = vpop.permute.xlu1 %1640  ;;  %1873 = vmatprep.mubr.f32.mxu0 %v2725_v0 }
  0xda   :  { %v1649_v31 = vsel %vm1646_vm7, %v1637_v24, %v1639_v29  ;;  %v1650_v32 = vsel %vm1646_vm7, %v1639_v29, %v1641_v30 }
  0xdb   :  { %2630 = vmatprep.subr.msk.mxu1 %vm82_vm1, %v1650_v32 }
  0xdc   :  { %2631 = vmatpush1.msk.msra.mxu1 %vm82_vm1, %v1649_v31 }
  0xdd   :  { %v1643_v33 = vpop.permute.xlu0 %1642  ;;  %2632 = vmatmul.mubr.msk.f32.vlgmr.msra.gmra.mxu1 %vm79_vm2, %v1624_v27  ;;  %v1645_v34 = vpop.permute.xlu1 %1644 }
  0xde   :  { %v1651_v35 = vsel %vm1646_vm7, %v1641_v30, %v1643_v33  ;;  %v1652_v36 = vsel %vm1646_vm7, %v1643_v33, %v1645_v34  ;;  %2000 = vmatprep.mubr.f32.mxu1 %v2725_v0 }
  0xdf   :  { %2633 = vmatprep.subr.msk.mxu0 %vm82_vm1, %v1652_v36 }
  0xe0   :  { %2634 = vmatpush1.msk.msra.mxu0 %vm82_vm1, %v1651_v35 }
  0xe1   :  { %v1904_v37 = vpop.permute.xlu0 %1903  ;;  %2635 = vmatmul.mubr.msk.f32.vlgmr.msra.gmra.mxu0 %vm79_vm2, %v1624_v27  ;;  %v1906_v38 = vpop.permute.xlu1 %1905 }
  0xe2   :  { %v1917_v39 = vsel %vm1915_vm8, %v1904_v37, %v1906_v38  ;;  %2071 = vmatprep.mubr.f32.mxu0 %v2725_v0 }
  0xe3   :  { %2636 = vmatprep.subr.msk.mxu1 %vm82_vm1, %v1917_v39 }
  0xe5   :  { %v1908_v40 = vpop.permute.xlu0 %1907  ;;  %v1910_v41 = vpop.permute.xlu1 %1909 }
  0xe6   :  { %v1918_v42 = vsel %vm1915_vm8, %v1906_v38, %v1908_v40  ;;  %v1919_v43 = vsel %vm1915_vm8, %v1908_v40, %v1910_v41  ;;  %v2426_v40 = vlaneseq }
  0xe7   :  { %2639 = vmatprep.subr.msk.mxu0 %vm82_vm1, %v1919_v43 }
  0xe8   :  { %2640 = vmatpush1.msk.msra.mxu0 %vm82_vm1, %v1918_v42 }
  0xe9   :  { %v1902_v44 = vpop.permute.xlu0 %1901  ;;  %v1893_v45 = vpop.permute.xlu1 %1892 }
  0xea   :  { %v1916_v46 = vsel %vm1915_vm8, %v1902_v44, %v1904_v37  ;;  %2641 = vmatmul.mubr.msk.f32.vlgmr.msra.gmra.mxu0 %vm79_vm2, %v1893_v45 }
  0xeb   :  { %2637 = vmatpush1.msk.msra.mxu1 %vm82_vm1, %v1916_v46  ;;  %2269 = vmatprep.mubr.f32.mxu0 %v2725_v0  ;;  %v3026_v46 = vshrl.u32 %v2426_v40, 7 }
  0xec   :  { %2638 = vmatmul.mubr.msk.f32.vlgmr.msra.gmra.mxu1 %vm79_vm2, %v1893_v45 }
  0xed   :  { %v1912_v47 = vpop.permute.xlu0 %1911  ;;  %v1914_v48 = vpop.permute.xlu1 %1913  ;;  %2142 = vmatprep.mubr.f32.mxu1 %v2725_v0 }
  0xee   :  { %v1920_v49 = vsel %vm1915_vm8, %v1910_v41, %v1912_v47  ;;  %v1921_v50 = vsel %vm1915_vm8, %v1912_v47, %v1914_v48 }
  0xef   :  { %2642 = vmatprep.subr.msk.mxu1 %vm82_vm1, %v1921_v50 }
  0xf0   :  { %2643 = vmatpush1.msk.msra.mxu1 %vm82_vm1, %v1920_v49 }
  0xf1   :  { %v2173_v51 = vpop.permute.xlu0 %2172  ;;  %2644 = vmatmul.mubr.msk.f32.vlgmr.msra.gmra.mxu1 %vm79_vm2, %v1893_v45  ;;  %v2175_v52 = vpop.permute.xlu1 %2174 }
  0xf2   :  { %v2186_v53 = vsel %vm2184_vm9, %v2173_v51, %v2175_v52  ;;  %2340 = vmatprep.mubr.f32.mxu1 %v2725_v0 }
  0xf3   :  { %2645 = vmatprep.subr.msk.mxu0 %vm82_vm1, %v2186_v53 }
  0xf5   :  { %v2171_v54 = vpop.permute.xlu0 %2170  ;;  %v2162_v55 = vpop.permute.xlu1 %2161 }
  0xf6   :  { %v2185_v56 = vsel %vm2184_vm9, %v2171_v54, %v2173_v51 }
  0xf7   :  { %2646 = vmatpush1.msk.msra.mxu0 %vm82_vm1, %v2185_v56 }
  0xf8   :  { %2647 = vmatmul.mubr.msk.f32.vlgmr.msra.gmra.mxu0 %vm79_vm2, %v2162_v55 }
  0xf9   :  { %v2177_v57 = vpop.permute.xlu0 %2176  ;;  %2411 = vmatprep.mubr.f32.mxu0 %v2725_v0 }
  0xfa   :  { %v2187_v58 = vsel %vm2184_vm9, %v2175_v52, %v2177_v57  ;;  %v2179_v59 = vpop.permute.xlu1 %2178 }
  0xfb   :  { %v2188_v60 = vsel %vm2184_vm9, %v2177_v57, %v2179_v59 }
  0xfc   :  { %2648 = vmatprep.subr.msk.mxu1 %vm82_vm1, %v2188_v60  ;;  %v2424_v60 = vld [vmem:[%s3063_s2] sm:$0x3f] }
  0xfd   :  { %2649 = vmatpush1.msk.msra.mxu1 %vm82_vm1, %v2187_v58  ;;  %v2181_v61 = vpop.permute.xlu0 %2180 }
  0xfe   :  { %v2189_v62 = vsel %vm2184_vm9, %v2179_v59, %v2181_v61  ;;  %2650 = vmatmul.mubr.msk.f32.vlgmr.msra.gmra.mxu1 %vm79_vm2, %v2162_v55  ;;  %v2183_v63 = vpop.permute.xlu1 %2182 }
  0xff   :  { %v2190_v1 = vsel %vm2184_vm9, %v2181_v61, %v2183_v63  ;;  %v2432_v63 = vsub.s32 1, %v3026_v46 }
 0x100   :  { %2651 = vmatprep.subr.msk.mxu0 %vm82_vm1, %v2190_v1 }
 0x101   :  { %2652 = vmatpush1.msk.msra.mxu0 %vm82_vm1, %v2189_v62 }
 0x102   :  { %2653 = vmatmul.mubr.msk.f32.vlgmr.msra.gmra.mxu0 %vm79_vm2, %v2162_v55  ;;  %v2428_v55 = vsub.s32 0, %v3026_v46 }
 0x149   :  { %v161_v2 = vpop.f32.mrf.mxu0 }
 0x14b   :  { %v163_v4 = vpop.f32.mrf.mxu0 }
 0x14d   :  { %v232_v3 = vpop.f32.mrf.mxu1 }
 0x14f   :  { %v234_v5 = vpop.f32.mrf.mxu1 }
 0x151   :  { %v303_v6 = vpop.f32.mrf.mxu0  ;;  %v394_v7 = vpop.f32.mrf.mxu1 }
 0x152   :  { %v395_v41 = vadd.f32 %v394_v7, %v161_v2 }
 0x153   :  { %v305_v8 = vpop.f32.mrf.mxu0  ;;  %v396_v9 = vpop.f32.mrf.mxu1 }
 0x154   :  { %v397_v43 = vadd.f32 %v396_v9, %v163_v4 }
 0x155   :  { %v465_v10 = vpop.f32.mrf.mxu0  ;;  %v536_v11 = vpop.f32.mrf.mxu1 }
 0x156   :  { %v466_v51 = vadd.f32 %v465_v10, %v232_v3  ;;  %v537_v61 = vadd.f32 %v536_v11, %v303_v6  ;;  %v2433_v6 = vrot.slane %v2424_v60, %v2432_v63  ;;  %v2436_v11 = vsub.s32 2, %v3026_v46 }
 0x157   :  { %v467_v12 = vpop.f32.mrf.mxu0  ;;  %v538_v13 = vpop.f32.mrf.mxu1 }
 0x158   :  { %v468_v56 = vadd.f32 %v467_v12, %v234_v5  ;;  %v539_v7 = vadd.f32 %v538_v13, %v305_v8 }
 0x159   :  { %v657_v14 = vpop.f32.mrf.mxu0 }
 0x15a   :  { %v804_v44 = vadd.f32 %v657_v14, %v395_v41  ;;  %v2429_v14 = vrot.slane %v2424_v60, %v2428_v55 }
 0x15b   :  { %v659_v16 = vpop.f32.mrf.mxu0 }
 0x15c   :  { %v805_v47 = vadd.f32 %v659_v16, %v397_v43  ;;  %v2437_v43 = vrot.slane %v2424_v60, %v2436_v11 }
 0x15d   :  { %v728_v15 = vpop.f32.mrf.mxu1 }
 0x15e   :  { %v806_v57 = vadd.f32 %v728_v15, %v466_v51 }
 0x15f   :  { %v730_v17 = vpop.f32.mrf.mxu1 }
 0x160   :  { %v807_v1 = vadd.f32 %v730_v17, %v468_v56 }
 0x161   :  { %v799_v18 = vpop.f32.mrf.mxu0 }
 0x162   :  { %v808_v9 = vadd.f32 %v799_v18, %v537_v61  ;;  %v2440_v18 = vsub.s32 3, %v3026_v46 }
 0x163   :  { %v801_v20 = vpop.f32.mrf.mxu0 }
 0x16a   :  { %v997_v21 = vpop.f32.mrf.mxu0 }
 0x16b   :  { %v1075_v2 = vadd.f32 %v997_v21, %v806_v57 }
 0x16c   :  { %v926_v19 = vpop.f32.mrf.mxu1  ;;  %v999_v23 = vpop.f32.mrf.mxu0 }
 0x16d   :  { %v1073_v48 = vadd.f32 %v926_v19, %v804_v44  ;;  %v1076_v5 = vadd.f32 %v999_v23, %v807_v1  ;;  %v809_v19 = vadd.f32 %v801_v20, %v539_v7 }
 0x16e   :  { %v928_v0 = vpop.f32.mrf.mxu1 }
 0x16f   :  { %v1074_v52 = vadd.f32 %v928_v0, %v805_v47 }
 0x171   :  { %v1068_v22 = vpop.f32.mrf.mxu1 }
 0x172   :  { %v1077_v0 = vadd.f32 %v1068_v22, %v808_v9 }
 0x173   :  { %v1070_v24 = vpop.f32.mrf.mxu1 }
 0x178   :  { %v1195_v25 = vpop.f32.mrf.mxu0 }
 0x179   :  { %v1342_v53 = vadd.f32 %v1195_v25, %v1073_v48 }
 0x17a   :  { %v1197_v27 = vpop.f32.mrf.mxu0 }
 0x17b   :  { %v1343_v58 = vadd.f32 %v1197_v27, %v1074_v52 }
 0x17d   :  { %v1266_v26 = vpop.f32.mrf.mxu1 }
 0x17e   :  { %v1344_v12 = vadd.f32 %v1266_v26, %v1075_v2 }
 0x17f   :  { %v1268_v28 = vpop.f32.mrf.mxu1 }
 0x181   :  { %v1337_v29 = vpop.f32.mrf.mxu0 }
 0x182   :  { %v1346_v8 = vadd.f32 %v1337_v29, %v1077_v0  ;;  %v2473_v0 = vld [vmem:[#allocation2] sm:$0xff] }
 0x183   :  { %v1339_v31 = vpop.f32.mrf.mxu0 }
 0x18a   :  { %v1535_v32 = vpop.f32.mrf.mxu0 }
 0x18b   :  { %v1613_v17 = vadd.f32 %v1535_v32, %v1344_v12  ;;  %v2444_v32 = vsub.s32 4, %v3026_v46 }
 0x18c   :  { %v1464_v30 = vpop.f32.mrf.mxu1  ;;  %v1537_v34 = vpop.f32.mrf.mxu0 }
 0x18d   :  { %v1611_v59 = vadd.f32 %v1464_v30, %v1342_v53  ;;  %v1345_v30 = vadd.f32 %v1268_v28, %v1076_v5  ;;  %v2445_v55 = vrot.slane %v2424_v60, %v2444_v32 }
 0x18e   :  { %v1466_v33 = vpop.f32.mrf.mxu1 }
 0x18f   :  { %v1612_v3 = vadd.f32 %v1466_v33, %v1343_v58  ;;  %v1614_v23 = vadd.f32 %v1537_v34, %v1345_v30  ;;  %v2448_v34 = vsub.s32 5, %v3026_v46 }
 0x191   :  { %v1606_v35 = vpop.f32.mrf.mxu1  ;;  %v2449_v58 = vrot.slane %v2424_v60, %v2448_v34 }
 0x192   :  { %v1615_v20 = vadd.f32 %v1606_v35, %v1346_v8 }
 0x193   :  { %v3024_v37 = vpop.f32.mrf.mxu1 }
 0x198   :  { %v1733_v36 = vpop.f32.mrf.mxu0 }
 0x199   :  { %v1880_v4 = vadd.f32 %v1733_v36, %v1611_v59  ;;  %v1078_v36 = vadd.f32 %v1070_v24, %v809_v19 }
 0x19a   :  { %v1735_v38 = vpop.f32.mrf.mxu0 }
 0x19b   :  { %v1881_v15 = vadd.f32 %v1735_v38, %v1612_v3  ;;  %v1347_v40 = vadd.f32 %v1339_v31, %v1078_v36 }
 0x19d   :  { %v1804_v39 = vpop.f32.mrf.mxu1  ;;  %v1616_v24 = vadd.f32 %v3024_v37, %v1347_v40  ;;  %v2513_v40 = vld [vmem:[%s3065_s4] sm:$0xff] }
 0x19e   :  { %v1882_v26 = vadd.f32 %v1804_v39, %v1613_v17 }
 0x19f   :  { %v1806_v45 = vpop.f32.mrf.mxu1 }
 0x1a0   :  { %v1883_v44 = vadd.f32 %v1806_v45, %v1614_v23  ;;  %v2511_v23 = vld [vmem:[%s3064_s3] sm:$0xff]  ;;  %s2742_s3 = smov [#allocation7]  }
 0x1a1   :  { %v1875_v42 = vpop.f32.mrf.mxu0  ;;  %s2562_s4 = sshll.u32 %s2742_s3, 4  ;;  %s2563_s4 = int_to_ptr.vmem [resolvable:$true] %s2562_s4 }
 0x1a2   :  { %v1884_v29 = vadd.f32 %v1875_v42, %v1615_v20  ;;  %s2700_s18 = scalar_lea.vmem %s2563_s4, 768  ;;  %p2705_p6 = scmp.lt.s32.totalorder %s2563_s4, %s2563_s4 }
 0x1a3   :  { %v1877_v49 = vpop.f32.mrf.mxu0  ;;  %p2701_p5 = scmp.ne.s32.totalorder %s2563_s4, %s2700_s18  ;;  %p2706_p7 = scmp.lt.s32.totalorder %s2700_s18, %s2700_s18 }
 0x1a4   :  { %v1885_v51 = vadd.f32 %v1877_v49, %v1616_v24 }
 0x1a5   :  { %p2707_p8 = por %p2706_p7, %p2705_p6 }
 0x1a7   :  { %p2708_p9 = pnand %p2707_p8, %p2701_p5 }
 0x1aa   :  { %v2073_v54 = vpop.f32.mrf.mxu0 }
 0x1ab   :  { %v2151_v47 = vadd.f32 %v2073_v54, %v1882_v26 }
 0x1ac   :  { %v2002_v50 = vpop.f32.mrf.mxu1  ;;  %v2075_v10 = vpop.f32.mrf.mxu0 }
 0x1ad   :  { %v2149_v16 = vadd.f32 %v2002_v50, %v1880_v4  ;;  %v2441_v50 = vrot.slane %v2424_v60, %v2440_v18  ;;  %v2152_v39 = vadd.f32 %v2075_v10, %v1883_v44  ;;  %v2741_v60 = vmov 0  }
 0x1ae   :  { %v2004_v62 = vpop.f32.mrf.mxu1  ;;  %2673 = vset.pattern.permute.xlu0 %v2741_v60  ;;  %2674 = vset.pattern.permute.xlu1 %v2741_v60 }
 0x1af   :  { %v2150_v21 = vadd.f32 %v2004_v62, %v1881_v15 }
 0x1b1   :  { %v2144_v25 = vpop.f32.mrf.mxu1 }
 0x1b2   :  { %v2153_v54 = vadd.f32 %v2144_v25, %v1884_v29 }
 0x1b3   :  { %v2146_v22 = vpop.f32.mrf.mxu1 }
 0x1b4   :  { %v2154_v56 = vadd.f32 %v2146_v22, %v1885_v51 }
 0x1b8   :  { %v2271_v27 = vpop.f32.mrf.mxu0 }
 0x1b9   :  { %v2418_v33 = vadd.f32 %v2271_v27, %v2149_v16 }
 0x1ba   :  { %v2273_v13 = vpop.f32.mrf.mxu0 }
 0x1bb   :  { %v2419_v38 = vadd.f32 %v2273_v13, %v2150_v21  ;;  %v3035_v41 = vmul.f32 %v2429_v14, %v2418_v33 }
 0x1bd   :  { %v3037_v28 = vmul.f32 %v2433_v6, %v2419_v38  ;;  %v2485_v52 = vmul.f32 %v3035_v41, %v3035_v41  ;;  %v2484_v6 = vld [vmem:[#allocation3] sm:$0xff] }
 0x1be   :  { %v2342_v48 = vpop.f32.mrf.mxu1 }
 0x1bf   :  { %v2474_v31 = vadd.f32 %v3037_v28, %v3035_v41  ;;  %v2486_v35 = vmul.f32 %v3037_v28, %v3037_v28  ;;  %v2420_v45 = vadd.f32 %v2342_v48, %v2151_v47 }
 0x1c0   :  { %v2344_v53 = vpop.f32.mrf.mxu1 }
 0x1c1   :  { %v2458_v37 = vmul.f32 %v2437_v43, %v2420_v45  ;;  %v2421_v42 = vadd.f32 %v2344_v53, %v2152_v39  ;;  %v2491_v57 = vadd.f32 %v2486_v35, %v2485_v52 }
 0x1c2   :  { %v2413_v46 = vpop.f32.mrf.mxu0 }
 0x1c3   :  { %v2475_v59 = vadd.f32 %v2474_v31, %v2458_v37  ;;  %v2487_v61 = vmul.f32 %v2458_v37, %v2458_v37  ;;  %v2459_v62 = vmul.f32 %v2441_v50, %v2421_v42  ;;  %v2422_v63 = vadd.f32 %v2413_v46, %v2153_v54 }
 0x1c4   :  { %v2415_v1 = vpop.f32.mrf.mxu0 }
 0x1c5   :  { %v2488_v2 = vmul.f32 %v2459_v62, %v2459_v62  ;;  %v2460_v3 = vmul.f32 %v2445_v55, %v2422_v63  ;;  %v2423_v49 = vadd.f32 %v2415_v1, %v2154_v56  ;;  %v2476_v4 = vadd.f32 %v2475_v59, %v2459_v62 }
 0x1c6   :  { %v2492_v7 = vadd.f32 %v2491_v57, %v2487_v61 }
 0x1c7   :  { %v2461_v9 = vmul.f32 %v2449_v58, %v2423_v49  ;;  %v2477_v10 = vadd.f32 %v2476_v4, %v2460_v3  ;;  %v2489_v14 = vmul.f32 %v2460_v3, %v2460_v3 }
 0x1c8   :  { %v2493_v5 = vadd.f32 %v2492_v7, %v2488_v2 }
 0x1c9   :  { %v2478_v12 = vadd.f32 %v2477_v10, %v2461_v9  ;;  %v2490_v15 = vmul.f32 %v2461_v9, %v2461_v9 }
 0x1ca   :  { %v2494_v16 = vadd.f32 %v2493_v5, %v2489_v14 }
 0x1cb   :  { %2479 = vadd.xlane.f32.xlu0 %v2478_v12 }
 0x1cc   :  { %v2495_v19 = vadd.f32 %v2494_v16, %v2490_v15 }
 0x1ce   :  { %2496 = vadd.xlane.f32.xlu1 %v2495_v19 }
 0x254   :  { %v2480_v25 = vpop.xlane.xlu0 %2479 }
 0x255   :  { %v2481_v27 = vadd.f32 %v2480_v25, %v2473_v0 }
 0x257   :  { %2483 = vst.msk [vmem:[#allocation2] sm:$0xff] %vm37_vm10, %v2481_v27  ;;  %v2497_v11 = vpop.xlane.xlu1 %2496 }
 0x258   :  { %v2498_v30 = vadd.f32 %v2497_v11, %v2484_v6 }
 0x25a   :  { %2499 = vst.msk [vmem:[#allocation3] sm:$0xff] %vm37_vm10, %v2498_v30 }
 0x25e   :  { %v2503_v17 = vld [vmem:[#allocation2] sm:$0xff] }
 0x25f   :  { %v2504_v21 = vmul.f32 0.001953125, %v2503_v17 }
 0x261   :  { %v2505_v33 = vld [vmem:[#allocation3] sm:$0xff]  ;;  %v2507_v36 = vmul.f32 %v2504_v21, %v2504_v21 }
 0x262   :  { %v2506_v8 = vmul.f32 0.001953125, %v2505_v33 }
 0x264   :  { %v2508_v13 = vsub.f32 %v2506_v8, %v2507_v36 }
 0x266   :  { %v2509_v18 = vadd.f32 1e-05, %v2508_v13 }
 0x268   :  { %2678 = vrsqrt.f32 %v2509_v18 }
 0x275   :  { %v2679_v26 = vpop.eup %2678 }
 0x276   :  { %v2512_v38 = vmul.f32 %v2679_v26, %v2511_v23 }
 0x278   :  { %2524 = vperm.xlu0 %2673, %v2512_v38   ;;  %v2514_v20 = vmul.f32 %v2512_v38, %v2504_v21 }
 0x27a   :  { %v2515_v22 = vsub.f32 %v2513_v40, %v2514_v20 }
 0x27c   :  { %2535 = vperm.xlu1 %2674, %v2515_v22  }
 0x2f3   :  { %v2525_v43 = vpop.permute.xlu0 %2524 }
 0x2f4   :  { %v2527_v44 = vmul.f32 %v2525_v43, %v3035_v41  ;;  %v2528_v47 = vmul.f32 %v2525_v43, %v3037_v28  ;;  %v2529_v32 = vmul.f32 %v2525_v43, %v2458_v37  ;;  %v2530_v24 = vmul.f32 %v2525_v43, %v2459_v62 }
 0x2f5   :  { %v2531_v29 = vmul.f32 %v2525_v43, %v2460_v3  ;;  %v2532_v48 = vmul.f32 %v2525_v43, %v2461_v9 }
 0x2f7   :  { %v2536_v50 = vpop.permute.xlu1 %2535 }
 0x2f8   :  { %v2538_v34 = vadd.f32 %v2536_v50, %v2527_v44  ;;  %v2539_v39 = vadd.f32 %v2536_v50, %v2528_v47  ;;  %v2540_v31 = vadd.f32 %v2536_v50, %v2529_v32  ;;  %v2541_v35 = vadd.f32 %v2536_v50, %v2530_v24 }
 0x2f9   :  { %v2542_v45 = vadd.f32 %v2536_v50, %v2531_v29  ;;  %v2543_v51 = vadd.f32 %v2536_v50, %v2532_v48 }
 0x2fa   :  { %v2544_v52 = vmax.f32 %v2538_v34, 0.0  ;;  %v2545_v53 = vmax.f32 %v2539_v39, 0.0  ;;  %v2546_v54 = vmax.f32 %v2540_v31, 0.0  ;;  %v2547_v42 = vmax.f32 %v2541_v35, 0.0 }
 0x2fb   :  { %v2548_v41 = vmax.f32 %v2542_v45, 0.0  ;;  %v2549_v55 = vmax.f32 %v2543_v51, 0.0 }
 0x2fc   :  { %2550 = vst [vmem:[#allocation7] sm:$0xff] %v2544_v52  ;;  %2551 = vst [vmem:[#allocation7 + $0x8] sm:$0xff] %v2545_v53 }
 0x2fd   :  { %2552 = vst [vmem:[#allocation7 + $0x10] sm:$0xff] %v2546_v54  ;;  %2553 = vst [vmem:[#allocation7 + $0x18] sm:$0xff] %v2547_v42 }
 0x2fe   :  { %2554 = vst [vmem:[#allocation7 + $0x20] sm:$0xff] %v2548_v41  ;;  %2555 = vst [vmem:[#allocation7 + $0x28] sm:$0xff] %v2549_v55 }
 0x2ff   :  { %2711 = shalt.err (!%p2708_p9)
}
 0x300   :  { %2565 = dma.vmem_to_hbm [thread:$0]  %s2563_s4, 768, %s3066_s5, [#allocation6]  }
 0x301   :  { %2722 = dma.done.wait [#allocation6], 768  }
 0x302   :  { %2723 = vsyncadd [#allocation6], 4294966528 }
 0x303   :  { %2569 = vsyncpa [#allocation5], 1 }
 0x304   :  { %2570 = vsyncpa [#allocation6], 1 }

</bundles_post_ra>
